<compile_context>
chip_gen: v7x
topology: tpu7x:2x2x1
jax: 0.10.0
libtpu: 0.0.40
codegen_flags: <defaults>
</compile_context>

<pallas_src>
import functools

import jax
import jax.numpy as jnp
from jax.experimental import pallas as pl
from jax.experimental.pallas import tpu as pltpu


def _round_up(x, m):
    return ((x + m - 1) // m) * m


# Per-generation budget for the 2 inputs x 2 pipeline buffers, explicit scoped
# VMEM limit (None -> keep the default), and TensorCores per chip.
_CHIP_CONFIG = {
    "v5e": dict(vmem_budget=12 << 20, vmem_limit=None, cores=1),      # 16 MiB default scoped
    "v6e": dict(vmem_budget=26 << 20, vmem_limit=48 << 20, cores=1),  # 128 MiB physical
    "v7x": dict(vmem_budget=44 << 20, vmem_limit=56 << 20, cores=2),  # 64 MiB physical / TC
    "unknown": dict(vmem_budget=12 << 20, vmem_limit=None, cores=1),
}


def _detect_chip():
    try:
        kind = jax.devices()[0].device_kind.lower()
    except Exception:
        return "unknown"
    if "v5e" in kind or "v5 lite" in kind or "v5lite" in kind:
        return "v5e"
    if "v6" in kind:
        return "v6e"
    if "v7" in kind or "7x" in kind:
        return "v7x"
    return "unknown"


def _sum_tile(f10_ref, f20_ref, tile_n):
    """Reduce a (tile_n, D) tile of (f10 + f20) to (8, D) with pure vreg adds."""
    d = f10_ref.shape[-1]
    unroll = min(8, tile_n // 8)

    def body(i, acc):
        sl = pl.ds(pl.multiple_of(i * 8, 8), 8)
        return acc + (f10_ref[sl, :].astype(jnp.float32)
                      + f20_ref[sl, :].astype(jnp.float32))

    return jax.lax.fori_loop(0, tile_n // 8, body,
                             jnp.zeros((8, d), jnp.float32), unroll=unroll)


def _sum_tile_masked(f10_ref, f20_ref, tile_n, base_row, n_rows):
    """Same as _sum_tile, but zeroes rows whose global index is >= n_rows."""
    d = f10_ref.shape[-1]
    unroll = min(8, tile_n // 8)
    sub_iota = jax.lax.broadcasted_iota(jnp.int32, (8, 1), 0)   # hoisted

    def body(i, acc):
        sl = pl.ds(pl.multiple_of(i * 8, 8), 8)
        t = (f10_ref[sl, :].astype(jnp.float32)
             + f20_ref[sl, :].astype(jnp.float32))
        row = base_row + i * 8 + sub_iota
        # Select, not multiply: OOB rows of the padded edge block may hold
        # garbage/NaN; 0 * NaN would poison the accumulator.
        return acc + jnp.where(row < n_rows, t, 0.0)

    return jax.lax.fori_loop(0, tile_n // 8, body,
                             jnp.zeros((8, d), jnp.float32), unroll=unroll)


def _zoom_reduce_kernel(f10_ref, f20_ref, part_ref, *, n_rows, tile_n,
                        steps_per_core, needs_mask):
    step = pl.program_id(1)

    @pl.when(step == 0)
    def _init():
        part_ref[...] = jnp.zeros_like(part_ref)

    if needs_mask:
        gidx = pl.program_id(0) * steps_per_core + step
        is_partial = (gidx + 1) * tile_n > n_rows

        @pl.when(jnp.logical_not(is_partial))
        def _full():
            part_ref[...] += _sum_tile(f10_ref, f20_ref, tile_n)

        @pl.when(is_partial)
        def _partial():
            part_ref[...] += _sum_tile_masked(f10_ref, f20_ref, tile_n,
                                              gidx * tile_n, n_rows)
    else:
        part_ref[...] += _sum_tile(f10_ref, f20_ref, tile_n)


def _zoom_head_kernel(part_ref, w_ref, b_ref, probs_ref, logits_ref, *, scale):
    # One-time 8*n_cores -> 1 cross-sublane reduce; fusion scale (0.5/1.0) and
    # the 1/N mean divisor are folded into a single scalar.
    pooled = jnp.sum(part_ref[...], axis=0, keepdims=True) * scale     # (1, D)
    w = w_ref[...].astype(jnp.float32)                                 # (C, D)
    logits = jax.lax.dot_general(
        pooled, w, dimension_numbers=(((1,), (1,)), ((), ())),         # contract D
        preferred_element_type=jnp.float32) + b_ref[...]               # (1, C)

    # Numerically stable softmax over classes.
    m = jnp.max(logits, axis=1, keepdims=True)
    e = jnp.exp(logits - m)
    s = jnp.sum(e, axis=1, keepdims=True)
    r = pl.reciprocal(s, approx=True)            # EUP slot
    r = r * (2.0 - s * r)                        # Newton step 1
    r = r * (2.0 - s * r)                        # Newton step 2
    probs_ref[...] = (e * r).astype(probs_ref.dtype)
    logits_ref[...] = logits.astype(logits_ref.dtype)


def zoom_fusion_classifier(feats_10x, feats_20x, weight, bias, fusion="avg",
                           tile_n=None, num_cores=None):
    """feats_*: (N, D); weight: (C, D); bias: (C,).

    Returns (probs, logits), each (1, C), matching the PyTorch module.
    tile_n / num_cores are auto-derived from the chip; tests may shrink/force.
    """
    if fusion == "avg":
        fusion_scale = 0.5
    elif fusion == "sum":
        fusion_scale = 1.0
    else:
        raise ValueError("Invalid fusion method. Choose 'avg', 'sum'")

    n, d = feats_10x.shape
    c, d_w = weight.shape
    assert d == d_w and feats_20x.shape == (n, d)

    cfg = _CHIP_CONFIG.get(_detect_chip(), _CHIP_CONFIG["unknown"])
    if num_cores is None:
        num_cores = cfg["cores"]

    # Sublane rounding: 8 rows for f32, 16 for bf16, 32 for int8/fp8 inputs.
    itemsize = jnp.dtype(feats_10x.dtype).itemsize
    sub = max(8, 32 // itemsize)

    # Row tile derived from the per-generation VMEM budget (2 inputs x 2
    # pipeline buffers); callers may only shrink it (tests).
    max_tn = max(sub, (cfg["vmem_budget"] // (4 * d * itemsize)) // sub * sub)
    tn = min(_round_up(n, sub), max_tn)
    if tile_n is not None:
        tn = min(tn, _round_up(tile_n, sub))

    num_tiles = pl.cdiv(n, tn)
    n_cores = max(1, min(num_cores, num_tiles))
    steps_per_core = pl.cdiv(num_tiles, n_cores)
    needs_mask = (n_cores * steps_per_core * tn != n)

    def feat_map(ci, si):
        # Clamp so the (at most n_cores-1) tiles past the end of N re-read the
        # last valid tile; the kernel fully masks their rows to zero.
        return (jnp.minimum(ci * steps_per_core + si, num_tiles - 1), 0)

    reduce_kernel = functools.partial(
        _zoom_reduce_kernel, n_rows=n, tile_n=tn,
        steps_per_core=steps_per_core, needs_mask=needs_mask)

    partials = pl.pallas_call(
        reduce_kernel,
        grid=(n_cores, steps_per_core),
        in_specs=[
            pl.BlockSpec((tn, d), feat_map),     # feats_10x tile
            pl.BlockSpec((tn, d), feat_map),     # feats_20x tile
        ],
        out_specs=pl.BlockSpec((8, d), lambda ci, si: (ci, 0)),
        out_shape=jax.ShapeDtypeStruct((n_cores * 8, d), jnp.float32),
        compiler_params=pltpu.CompilerParams(
            dimension_semantics=("parallel", "arbitrary"),
            vmem_limit_bytes=cfg["vmem_limit"]),
    )(feats_10x, feats_20x)

    scale = fusion_scale / n
    bias2 = bias.reshape(1, c).astype(jnp.float32)

    probs, logits = pl.pallas_call(
        functools.partial(_zoom_head_kernel, scale=scale),
        out_shape=(jax.ShapeDtypeStruct((1, c), jnp.float32),    # probs
                   jax.ShapeDtypeStruct((1, c), jnp.float32)),   # logits
    )(partials, weight, bias2)
    return probs, logits


if __name__ == "__main__":
    # Small shapes consistent with the module (N patches, feature_dim, classes).
    N, FEATURE_DIM, N_CLASSES = 40, 256, 2

    key = jax.random.PRNGKey(0)
    k1, k2, k3, k4 = jax.random.split(key, 4)

    feats_10x = jax.random.normal(k1, (N, FEATURE_DIM), dtype=jnp.float32)
    feats_20x = jax.random.normal(k2, (N, FEATURE_DIM), dtype=jnp.float32)

    # Deterministic synthetic parameters (nn.Linear-shaped).
    bound = 1.0 / (FEATURE_DIM ** 0.5)
    weight = jax.random.uniform(k3, (N_CLASSES, FEATURE_DIM),
                                minval=-bound, maxval=bound, dtype=jnp.float32)
    bias = jax.random.uniform(k4, (N_CLASSES,),
                              minval=-bound, maxval=bound, dtype=jnp.float32)

    def reference(f10, f20, fusion):
        fused = f10.astype(jnp.float32) + f20.astype(jnp.float32)
        fused = fused * (0.5 if fusion == "avg" else 1.0)
        pooled = fused.mean(axis=0, keepdims=True)
        logits = pooled @ weight.T + bias
        return jax.nn.softmax(logits, axis=1), logits

    # Cases:
    #  - tile_n=16  -> 3 tiles incl. a partial last tile (masked path).
    #  - tile_n=None -> one auto-sized tile (unmasked path).
    #  - num_cores=2 -> exercises the parallel core-split path (incl. one
    #    clamped fully-out-of-range tile), correct even on 1-TC chips.
    #  - bf16 inputs -> halved streaming bytes, 16-row sublane rounding.
    cases = [
        ("avg", 16, None, jnp.float32),
        ("sum", 16, None, jnp.float32),
        ("avg", None, None, jnp.float32),
        ("avg", 16, 2, jnp.float32),
        ("avg", 16, None, jnp.bfloat16),
    ]
    for fusion, tile_n, num_cores, dtype in cases:
        f10 = feats_10x.astype(dtype)
        f20 = feats_20x.astype(dtype)
        probs, logits = zoom_fusion_classifier(f10, f20, weight, bias,
                                               fusion=fusion, tile_n=tile_n,
                                               num_cores=num_cores)
        jax.block_until_ready((probs, logits))

        probs_ref, logits_ref = reference(f10, f20, fusion)
        tag = (fusion, tile_n, num_cores, str(dtype))
        assert jnp.allclose(logits, logits_ref, atol=1e-4, rtol=1e-4), tag
        assert jnp.allclose(probs, probs_ref, atol=1e-4, rtol=1e-4), tag
        assert jnp.allclose(jnp.sum(probs, axis=1), 1.0, atol=1e-5), tag

    print("KERNEL_OK")
</pallas_src>

<mosaic_0001>
module attributes {stable_mosaic.version = 11 : i64} {
  func.func @_zoom_reduce_kernel(%arg0: i32, %arg1: i32, %arg2: memref<16x256xf32, #tpu.memory_space<vmem>>, %arg3: memref<16x256xf32, #tpu.memory_space<vmem>>, %arg4: memref<8x256xf32, #tpu.memory_space<vmem>>) attributes {dimension_semantics = [#tpu.dimension_semantics<parallel>, #tpu.dimension_semantics<arbitrary>], iteration_bounds = array<i64: 1, 3>, scalar_prefetch = 0 : i64, scratch_operands = 0 : i64, tpu.core_type = #tpu.core_type<tc>, window_params = [{transform_indices = @transform_0, window_bounds = array<i64: 16, 256>}, {transform_indices = @transform_1, window_bounds = array<i64: 16, 256>}, {transform_indices = @transform_2, window_bounds = array<i64: 8, 256>}]} {
    %c0_i32 = arith.constant 0 : i32
    %0 = arith.cmpi eq, %arg1, %c0_i32 : i32
    %1 = arith.extui %0 : i1 to i32
    %c0_i32_0 = arith.constant 0 : i32
    %2 = arith.cmpi ne, %1, %c0_i32_0 : i32
    scf.if %2 {
      %cst = arith.constant 0.000000e+00 : f32
      %13 = vector.broadcast %cst : f32 to vector<8x256xf32>
      %c0 = arith.constant 0 : index
      %c0_3 = arith.constant 0 : index
      %14 = vector.load %arg4[%c0, %c0_3] : memref<8x256xf32, #tpu.memory_space<vmem>>, vector<8x256xf32>
      tpu.vector_store %arg4[%c0, %c0_3], %13 {strides = array<i32>} : memref<8x256xf32, #tpu.memory_space<vmem>>, vector<8x256xf32>,
    } else {
    }
    %c3_i32 = arith.constant 3 : i32
    %3 = arith.muli %arg0, %c3_i32 : i32
    %4 = arith.addi %3, %arg1 : i32
    %c1_i32 = arith.constant 1 : i32
    %5 = arith.addi %4, %c1_i32 : i32
    %c16_i32 = arith.constant 16 : i32
    %6 = arith.muli %5, %c16_i32 : i32
    %c40_i32 = arith.constant 40 : i32
    %7 = arith.cmpi sgt, %6, %c40_i32 : i32
    %true = arith.constant true
    %8 = arith.xori %7, %true : i1
    %9 = arith.extui %8 : i1 to i32
    %c0_i32_1 = arith.constant 0 : i32
    %10 = arith.cmpi ne, %9, %c0_i32_1 : i32
    scf.if %10 {
      %c0 = arith.constant 0 : index
      %c0_3 = arith.constant 0 : index
      %13 = vector.load %arg4[%c0, %c0_3] : memref<8x256xf32, #tpu.memory_space<vmem>>, vector<8x256xf32>
      %cst = arith.constant 0.000000e+00 : f32
      %14 = vector.broadcast %cst : f32 to vector<8x256xf32>
      %c0_i32_4 = arith.constant 0 : i32
      %c8_i32 = arith.constant 8 : i32
      %15 = arith.muli %c0_i32_4, %c8_i32 : i32
      %16 = tpu.assume_multiple %15, 8 : i32
      %17 = arith.index_cast %16 : i32 to index
      %c0_5 = arith.constant 0 : index
      %18 = vector.load %arg2[%17, %c0_5] : memref<16x256xf32, #tpu.memory_space<vmem>>, vector<8x256xf32>
      %19 = arith.index_cast %16 : i32 to index
      %c0_6 = arith.constant 0 : index
      %20 = vector.load %arg3[%19, %c0_6] : memref<16x256xf32, #tpu.memory_space<vmem>>, vector<8x256xf32>
      %21 = arith.addf %18, %20 : vector<8x256xf32>
      %22 = arith.addf %14, %21 : vector<8x256xf32>
      %c1_i32_7 = arith.constant 1 : i32
      %c8_i32_8 = arith.constant 8 : i32
      %23 = arith.muli %c1_i32_7, %c8_i32_8 : i32
      %24 = tpu.assume_multiple %23, 8 : i32
      %25 = arith.index_cast %24 : i32 to index
      %c0_9 = arith.constant 0 : index
      %26 = vector.load %arg2[%25, %c0_9] : memref<16x256xf32, #tpu.memory_space<vmem>>, vector<8x256xf32>
      %27 = arith.index_cast %24 : i32 to index
      %c0_10 = arith.constant 0 : index
      %28 = vector.load %arg3[%27, %c0_10] : memref<16x256xf32, #tpu.memory_space<vmem>>, vector<8x256xf32>
      %29 = arith.addf %26, %28 : vector<8x256xf32>
      %30 = arith.addf %22, %29 : vector<8x256xf32>
      %c2_i32 = arith.constant 2 : i32
      %31 = arith.addf %13, %30 : vector<8x256xf32>
      %c0_11 = arith.constant 0 : index
      %c0_12 = arith.constant 0 : index
      %32 = vector.load %arg4[%c0_11, %c0_12] : memref<8x256xf32, #tpu.memory_space<vmem>>, vector<8x256xf32>
      tpu.vector_store %arg4[%c0_11, %c0_12], %31 {strides = array<i32>} : memref<8x256xf32, #tpu.memory_space<vmem>>, vector<8x256xf32>,
    } else {
    }
    %11 = arith.extui %7 : i1 to i32
    %c0_i32_2 = arith.constant 0 : i32
    %12 = arith.cmpi ne, %11, %c0_i32_2 : i32
    scf.if %12 {
      %c0 = arith.constant 0 : index
      %c0_3 = arith.constant 0 : index
      %13 = vector.load %arg4[%c0, %c0_3] : memref<8x256xf32, #tpu.memory_space<vmem>>, vector<8x256xf32>
      %c16_i32_4 = arith.constant 16 : i32
      %14 = arith.muli %4, %c16_i32_4 : i32
      %15 = tpu.iota {dimensions = array<i32: 0>} : vector<8x1xi32>
      %cst = arith.constant 0.000000e+00 : f32
      %16 = vector.broadcast %cst : f32 to vector<8x256xf32>
      %c0_i32_5 = arith.constant 0 : i32
      %c8_i32 = arith.constant 8 : i32
      %17 = arith.muli %c0_i32_5, %c8_i32 : i32
      %18 = tpu.assume_multiple %17, 8 : i32
      %19 = arith.index_cast %18 : i32 to index
      %c0_6 = arith.constant 0 : index
      %20 = vector.load %arg2[%19, %c0_6] : memref<16x256xf32, #tpu.memory_space<vmem>>, vector<8x256xf32>
      %21 = arith.index_cast %18 : i32 to index
      %c0_7 = arith.constant 0 : index
      %22 = vector.load %arg3[%21, %c0_7] : memref<16x256xf32, #tpu.memory_space<vmem>>, vector<8x256xf32>
      %23 = arith.addf %20, %22 : vector<8x256xf32>
      %c8_i32_8 = arith.constant 8 : i32
      %24 = arith.muli %c0_i32_5, %c8_i32_8 : i32
      %25 = arith.addi %14, %24 : i32
      %26 = vector.broadcast %25 : i32 to vector<8x1xi32>
      %27 = arith.addi %26, %15 : vector<8x1xi32>
      %c40_i32_9 = arith.constant 40 : i32
      %28 = vector.broadcast %c40_i32_9 : i32 to vector<8x1xi32>
      %29 = arith.cmpi slt, %27, %28 : vector<8x1xi32>
      %cst_10 = arith.constant 0.000000e+00 : f32
      %30 = vector.shape_cast %29 : vector<8x1xi1> to vector<8x1xi1>
      %31 = vector.broadcast %30 : vector<8x1xi1> to vector<8x256xi1>
      %32 = vector.broadcast %cst_10 : f32 to vector<8x256xf32>
      %33 = arith.select %31, %23, %32 : vector<8x256xi1>, vector<8x256xf32>
      %34 = arith.addf %16, %33 : vector<8x256xf32>
      %c1_i32_11 = arith.constant 1 : i32
      %c8_i32_12 = arith.constant 8 : i32
      %35 = arith.muli %c1_i32_11, %c8_i32_12 : i32
      %36 = tpu.assume_multiple %35, 8 : i32
      %37 = arith.index_cast %36 : i32 to index
      %c0_13 = arith.constant 0 : index
      %38 = vector.load %arg2[%37, %c0_13] : memref<16x256xf32, #tpu.memory_space<vmem>>, vector<8x256xf32>
      %39 = arith.index_cast %36 : i32 to index
      %c0_14 = arith.constant 0 : index
      %40 = vector.load %arg3[%39, %c0_14] : memref<16x256xf32, #tpu.memory_space<vmem>>, vector<8x256xf32>
      %41 = arith.addf %38, %40 : vector<8x256xf32>
      %c8_i32_15 = arith.constant 8 : i32
      %42 = arith.muli %c1_i32_11, %c8_i32_15 : i32
      %43 = arith.addi %14, %42 : i32
      %44 = vector.broadcast %43 : i32 to vector<8x1xi32>
      %45 = arith.addi %44, %15 : vector<8x1xi32>
      %c40_i32_16 = arith.constant 40 : i32
      %46 = vector.broadcast %c40_i32_16 : i32 to vector<8x1xi32>
      %47 = arith.cmpi slt, %45, %46 : vector<8x1xi32>
      %cst_17 = arith.constant 0.000000e+00 : f32
      %48 = vector.shape_cast %47 : vector<8x1xi1> to vector<8x1xi1>
      %49 = vector.broadcast %48 : vector<8x1xi1> to vector<8x256xi1>
      %50 = vector.broadcast %cst_17 : f32 to vector<8x256xf32>
      %51 = arith.select %49, %41, %50 : vector<8x256xi1>, vector<8x256xf32>
      %52 = arith.addf %34, %51 : vector<8x256xf32>
      %c2_i32 = arith.constant 2 : i32
      %53 = arith.addf %13, %52 : vector<8x256xf32>
      %c0_18 = arith.constant 0 : index
      %c0_19 = arith.constant 0 : index
      %54 = vector.load %arg4[%c0_18, %c0_19] : memref<8x256xf32, #tpu.memory_space<vmem>>, vector<8x256xf32>
      tpu.vector_store %arg4[%c0_18, %c0_19], %53 {strides = array<i32>} : memref<8x256xf32, #tpu.memory_space<vmem>>, vector<8x256xf32>,
    } else {
    }
    return
  }
  func.func @transform_0(%arg0: i32, %arg1: i32) -> (i32, i32) {
    %c3_i32 = arith.constant 3 : i32
    %0 = arith.muli %arg0, %c3_i32 : i32
    %1 = arith.addi %0, %arg1 : i32
    %c2_i32 = arith.constant 2 : i32
    %2 = arith.minsi %1, %c2_i32 : i32
    %c0_i32 = arith.constant 0 : i32
    %c0_i32_0 = arith.constant 0 : i32
    return %2, %c0_i32 : i32, i32
  }
  func.func @transform_1(%arg0: i32, %arg1: i32) -> (i32, i32) {
    %c3_i32 = arith.constant 3 : i32
    %0 = arith.muli %arg0, %c3_i32 : i32
    %1 = arith.addi %0, %arg1 : i32
    %c2_i32 = arith.constant 2 : i32
    %2 = arith.minsi %1, %c2_i32 : i32
    %c0_i32 = arith.constant 0 : i32
    %c0_i32_0 = arith.constant 0 : i32
    return %2, %c0_i32 : i32, i32
  }
  func.func @transform_2(%arg0: i32, %arg1: i32) -> (i32, i32) {
    %c0_i32 = arith.constant 0 : i32
    %c0_i32_0 = arith.constant 0 : i32
    return %arg0, %c0_i32 : i32, i32
  }
}

</mosaic_0001>

<bundles_post_ra>
// kernel: tpu_custom_call.1
= control target key start
LH: loop header
LB: loop body
LE: loop exit
PB: predicated region body
PF: predicated region fallthrough
CT: control target
= control target key end

     0   :  { %7 = vsyncpa [#allocation3], 0  ;;  %s971_s0 = inlined_call_operand.hbm [shape: f32[40,256], index: 0, kind: input, shape index: {}]   ;;  %s972_s1 = inlined_call_operand.hbm [shape: f32[40,256], index: 1, kind: input, shape index: {}]   ;;  %s973_s2 = inlined_call_operand.hbm [shape: f32[8,256], index: 2, kind: output, shape index: {}]  }
   0x1   :  { %9 = vsyncpa [#allocation3 + $0x1], 0 }
   0x2   :  { %10 = vsyncpa [#allocation6], 0 }
   0x3   :  { %12 = vsyncpa [#allocation6 + $0x1], 0 }
   0x4   :  { %13 = vsyncpa [#allocation4], 0  ;;  %s741_s9 = smov 0   ;;  %s743_s10 = smov 0  }
   0x5   :  { %s745_s11 = smov 0   ;;  %s747_s12 = smov 0  }
   0x6   :  { %s749_s13 = smov 0   ;;  %s751_s14 = smov 0  }
   0x7 LB: > { %s28_s15 = sadd.s32 1, %s712_s13  ;;  %p37_p1 = scmp.lt.s32.totalorder %s712_s13, 2  ;;  %s716_s14 = sphi %s751_s14, %s19_s14   ;;  %s712_s13 = sphi %s749_s13, %s981_s13   ;;  %s708_s12 = sphi %s747_s12, %s980_s12   ;;  %s704_s11 = sphi %s745_s11, %s979_s11   ;;  %s700_s10 = sphi %s743_s10, %s978_s10   ;;  %s696_s9 = sphi %s741_s9, %s977_s9  }
   0x8   : > { %p29_p0 = scmp.ge.s32.totalorder %s28_s15, 3  ;;  %s465_s16 = sadd.s32 4294967295, %s716_s14  }
   0x9   : > { %p53_p2 = scmp.ne.s32.totalorder %s704_s11, %s700_s10  ;;  %p54_p4 = scmp.eq.s32.totalorder %s716_s14, 0 }
   0xa   : > { %s983_s15 = smov (%p29_p0, %s28_s15), 0  ;;  %p59_p5 = scmp.ne.s32.totalorder %s700_s10, %s696_s9 }
   0xb   : > { %s777_s17 = scalar_select %p37_p1, %s712_s13, 2 }
   0xc   : > { %p41_p3 = scmp.lt.s32.totalorder %s983_s15, 2  ;;  %p60_p6 = scmp.eq.s32.totalorder %s465_s16, 0 }
   0xd   : > { %p785_p7 = por %p54_p4, %p53_p2  ;;  %s46_s22 = sadd.s32 1, %s704_s11 }
   0xe   : > { %s42_s18 = scalar_select %p41_p3, %s983_s15, 2 }
   0xf   : > { %p789_p8 = por %p60_p6, %p59_p5  ;;  %p467_p10 = scmp.ge.s32.totalorder %s716_s14, 3 }
  0x10   : > { %s43_s21 = ssub.s32 %s777_s17, %s42_s18 }
  0x11   : > { %p44_p9 = scmp.eq.s32.totalorder %s43_s21, 0  ;;  %139 = sbr.rel (%p467_p10) target bundleno = 94 (0x5e), region = 16 }
  0x13   : > { %s796_s23 = scalar_select %p44_p9, %s704_s11, %s46_s22  }
  0x18   : > { %142 = sbr.rel (!%p785_p7) target bundleno = 59 (0x3b), region = 20  ;;  %s143_s24 = sand.u32 (%p785_p7), 1, %s704_s11  }
  0x19   : > { %s469_s25 = sshll.u32 (%p785_p7), %s777_s17, 1  ;;  %s468_s26 = sshll.u32 (%p785_p7), %s143_s24, 5 }
  0x1a   : > { %s153_s27 = ssub.s32 (%p785_p7), 5, %s469_s25  ;;  %s806_s30 = scalar_lea.sflag (%p785_p7), [#allocation3], %s143_s24 }
  0x1b   : > { %p154_p11 = scmp.lt.s32.totalorder (%p785_p7), %s153_s27, 2  ;;  %s147_s3 = scalar_lea.vmem (%p785_p7), [#allocation2], %s468_s26 }
  0x1f   : > { %s985_s27 = smov (!%p154_p11, %s153_s27), 2 }
  0x20   : > { %s803_s28 = sshll.u32 %s985_s27, 8 }
  0x21   : > { %s159_s29 = ssub.s32 512, %s803_s28 }
  0x22   : > { %160 = vsyncadd %s806_s30, %s159_s29  ;;  %p472_p12 = scmp.ne.s32.totalorder %s803_s28, 0  ;;  %s508_s4 = sshll.u32 %s777_s17, 9 }
  0x23   : > { %s814_s7 = scalar_lea.hbm %s971_s0, %s508_s4  ;;  %s166_s8 = sshll.u32 %s147_s3, 4  ;;  %s816_s8 = int_to_ptr.vmem [resolvable:$true] %s166_s8 }
  0x24   : > { %s576_s9 = scalar_lea.hbm %s814_s7, %s803_s28  ;;  %s580_s22 = scalar_lea.hbm %s971_s0, 1280 }
  0x25   : > { %p577_p13 = scmp.ne.s32.totalorder %s814_s7, %s576_s9  ;;  %p581_p2 = scmp.lt.u32.totalorder %s814_s7, %s971_s0 }
  0x26   : > { %p582_p3 = scmp.lt.u32.totalorder %s580_s22, %s576_s9  ;;  %p584_p5 = scmp.lt.u32.totalorder %s576_s9, %s814_s7 }
  0x27   : > { %p578_p0 = pnand %p577_p13, %p472_p12 }
  0x28   : > { %p583_p4 = por %p582_p3, %p581_p2 }
  0x29   : > { %p579_p1 = pneg %p578_p0 }
  0x2a   : > { %p585_p6 = por %p584_p5, %p583_p4 }
  0x2c   : > { %p586_p9 = pnand %p585_p6, %p579_p1 }
  0x2e   : > { %589 = shalt.err (!%p586_p9)
}
  0x2f   : > { %s590_s26 = scalar_lea.vmem %s816_s8, %s803_s28  ;;  %s718_s27 = smov [#allocation2]  }
  0x30   : > { %p591_p10 = scmp.ne.s32.totalorder %s816_s8, %s590_s26  ;;  %s594_s29 = sshll.u32 %s718_s27, 4  ;;  %s595_s29 = int_to_ptr.vmem [resolvable:$false] %s594_s29 }
  0x31   : > { %s596_s3 = scalar_lea.vmem %s595_s29, 1024  ;;  %p597_p0 = scmp.lt.s32.totalorder %s816_s8, %s595_s29 }
  0x32   : > { %p592_p11 = pnand %p591_p10, %p472_p12  ;;  %p598_p2 = scmp.lt.s32.totalorder %s596_s3, %s590_s26 }
  0x34   : > { %p593_p13 = pneg %p592_p11  ;;  %p599_p3 = por %p598_p2, %p597_p0 }
  0x36   : > { %p600_p4 = pnand %p599_p3, %p593_p13 }
  0x38   : > { %603 = shalt.err (!%p600_p4)
}
  0x39   : > { %s719_s4 = smov 256   ;;  %s720_s5 = smov 16  }
  0x3a   : > { %172 = dma.hbm_to_vmem [thread:$0]  (%p472_p12), %s814_s7, %s803_s28, %s816_s8, %s806_s30, %s719_s4, %s719_s4, %s720_s5  }
  0x3b PF: > { %175 = sbr.rel (!%p785_p7) target bundleno = 94 (0x5e), region = 24  ;;  %s176_s6 = sand.u32 (%p785_p7), 1, %s704_s11  }
  0x3c   : > { %s478_s9 = sshll.u32 (%p785_p7), %s777_s17, 1  ;;  %s477_s18 = sshll.u32 (%p785_p7), %s176_s6, 5 }
  0x3d   : > { %s186_s21 = ssub.s32 (%p785_p7), 5, %s478_s9  ;;  %s850_s25 = scalar_lea.sflag (%p785_p7), [#allocation6], %s176_s6 }
  0x3e   : > { %p187_p1 = scmp.lt.s32.totalorder (%p785_p7), %s186_s21, 2  ;;  %s180_s28 = scalar_lea.vmem (%p785_p7), [#allocation5], %s477_s18 }
  0x42   : > { %s987_s21 = smov (!%p187_p1, %s186_s21), 2 }
  0x43   : > { %s847_s22 = sshll.u32 %s987_s21, 8 }
  0x44   : > { %s192_s24 = ssub.s32 512, %s847_s22 }
  0x45   : > { %193 = vsyncadd %s850_s25, %s192_s24  ;;  %p481_p7 = scmp.ne.s32.totalorder %s847_s22, 0  ;;  %s511_s19 = sshll.u32 %s777_s17, 9 }
  0x46   : > { %s858_s8 = scalar_lea.hbm %s972_s1, %s511_s19  ;;  %s199_s26 = sshll.u32 %s180_s28, 4  ;;  %s860_s26 = int_to_ptr.vmem [resolvable:$true] %s199_s26 }
  0x47   : > { %s604_s27 = scalar_lea.hbm %s858_s8, %s847_s22  ;;  %s608_s17 = scalar_lea.hbm %s972_s1, 1280 }
  0x48   : > { %p605_p12 = scmp.ne.s32.totalorder %s858_s8, %s604_s27  ;;  %p609_p9 = scmp.lt.u32.totalorder %s858_s8, %s972_s1 }
  0x49   : > { %p610_p10 = scmp.lt.u32.totalorder %s608_s17, %s604_s27  ;;  %p612_p13 = scmp.lt.u32.totalorder %s604_s27, %s858_s8 }
  0x4a   : > { %p606_p5 = pnand %p605_p12, %p481_p7 }
  0x4b   : > { %p611_p11 = por %p610_p10, %p609_p9 }
  0x4c   : > { %p607_p6 = pneg %p606_p5 }
  0x4d   : > { %p613_p0 = por %p612_p13, %p611_p11 }
  0x4f   : > { %p614_p2 = pnand %p613_p0, %p607_p6 }
  0x51   : > { %617 = shalt.err (!%p614_p2)
}
  0x52   : > { %s618_s6 = scalar_lea.vmem %s860_s26, %s847_s22  ;;  %s721_s9 = smov [#allocation5]  }
  0x53   : > { %p619_p3 = scmp.ne.s32.totalorder %s860_s26, %s618_s6  ;;  %s622_s18 = sshll.u32 %s721_s9, 4  ;;  %s623_s18 = int_to_ptr.vmem [resolvable:$false] %s622_s18 }
  0x54   : > { %s624_s21 = scalar_lea.vmem %s623_s18, 1024  ;;  %p625_p12 = scmp.lt.s32.totalorder %s860_s26, %s623_s18 }
  0x55   : > { %p620_p4 = pnand %p619_p3, %p481_p7  ;;  %p626_p5 = scmp.lt.s32.totalorder %s624_s21, %s618_s6 }
  0x57   : > { %p621_p1 = pneg %p620_p4  ;;  %p627_p9 = por %p626_p5, %p625_p12 }
  0x59   : > { %p628_p10 = pnand %p627_p9, %p621_p1 }
  0x5b   : > { %631 = shalt.err (!%p628_p10)
}
  0x5c   : > { %s722_s24 = smov 256   ;;  %s723_s28 = smov 16  }
  0x5d   : > { %205 = dma.hbm_to_vmem [thread:$0]  (%p481_p7), %s858_s8, %s847_s22, %s860_s26, %s850_s25, %s722_s24, %s722_s24, %s723_s28  }
  0x5e PF: > { %p486_p6 = scmp.ge.s32.totalorder %s716_s14, 1  ;;  %p207_p11 = scmp.lt.s32.totalorder %s716_s14, 4 }
  0x60   : > { %p208_p13 = pnand %p486_p6, %p207_p11 }
  0x61   : > { %s213_s19 = sand.u32 (!%p208_p13), 1, %s700_s10  }
  0x62   : > { %211 = sbr.rel (%p208_p13) target bundleno = 170 (0xaa), region = 28  ;;  %s487_s30 = sshll.u32 (!%p208_p13), %s213_s19, 5 }
  0x63   : > { %s214_s7 = scalar_lea.sflag (!%p208_p13), [#allocation3], %s213_s19  ;;  %s890_s27 = scalar_lea.vmem (!%p208_p13), [#allocation2], %s487_s30 }
  0x69   : > { %683 = dma.done.wait (%p789_p8), %s214_s7, 512  }
  0x6a   : > { %685 = vsyncadd (%p789_p8), %s214_s7, 4294966784  ;;  %s223_s22 = scalar_lea.sflag [#allocation6], %s213_s19  ;;  %s896_s25 = scalar_lea.vmem [#allocation5], %s487_s30 }
  0x6b   : > { %687 = dma.done.wait (%p789_p8), %s223_s22, 512  }
  0x6c   : > { %689 = vsyncadd (%p789_p8), %s223_s22, 4294966784  ;;  %p489_p7 = scmp.ne.s32.totalorder %s708_s12, 0 }
  0x6d   : > { %v724_v0 = vmov (!%p489_p7), 0.0  }
  0x6e   : > { %270 = sbr.rel (%p489_p7) target bundleno = 117 (0x75), region = 40  ;;  %271 = vst [vmem:[#allocation7] sm:$0xff] (!%p489_p7), %v724_v0  ;;  %272 = vst [vmem:[#allocation7 + $0x8] sm:$0xff] (!%p489_p7), %v724_v0 }
  0x75 PF: > { %s904_s8 = sshll.u32 %s708_s12, 4 }
  0x76   : > { %s513_s26 = sadd.s32 16, %s904_s8 }
  0x77   : > { %p491_p0 = scmp.gt.s32.totalorder %s513_s26, 40 }
  0x78   : > { %v287_v1 = vld [vmem:[%s890_s27] sm:$0xff] (!%p491_p0)  ;;  %v492_v4 = vld [vmem:[%s890_s27 + $0x10] sm:$0xff] (!%p491_p0)  ;;  %v288_v7 = vld [vmem:[%s890_s27 + $0x8] sm:$0xff] (!%p491_p0) }
  0x79   : > { %281 = sbr.rel (%p491_p0) target bundleno = 131 (0x83), region = 44  ;;  %v291_v2 = vld [vmem:[%s896_s25] sm:$0xff] (!%p491_p0)  ;;  %v494_v5 = vld [vmem:[%s896_s25 + $0x10] sm:$0xff] (!%p491_p0)  ;;  %v292_v8 = vld [vmem:[%s896_s25 + $0x8] sm:$0xff] (!%p491_p0) }
  0x7a   : > { %v293_v3 = vadd.f32 (!%p491_p0), %v291_v2, %v287_v1  ;;  %v306_v6 = vadd.f32 (!%p491_p0), %v494_v5, %v492_v4  ;;  %v493_v9 = vld [vmem:[%s890_s27 + $0x18] sm:$0xff] (!%p491_p0)  ;;  %v282_v10 = vld [vmem:[#allocation7] sm:$0xff] (!%p491_p0)  ;;  %v294_v11 = vadd.f32 (!%p491_p0), %v292_v8, %v288_v7  ;;  %v283_v15 = vld [vmem:[#allocation7 + $0x8] sm:$0xff] (!%p491_p0) }
  0x7b   : > { %v495_v12 = vld [vmem:[%s896_s25 + $0x18] sm:$0xff] (!%p491_p0) }
  0x7c   : > { %v308_v13 = vadd.f32 (!%p491_p0), %v306_v6, %v293_v3  ;;  %v307_v14 = vadd.f32 (!%p491_p0), %v495_v12, %v493_v9 }
  0x7e   : > { %v310_v16 = vadd.f32 (!%p491_p0), %v308_v13, %v282_v10  ;;  %v309_v17 = vadd.f32 (!%p491_p0), %v307_v14, %v294_v11 }
  0x80   : > { %312 = vst [vmem:[#allocation7] sm:$0xff] %v310_v16  ;;  %v311_v18 = vadd.f32 %v309_v17, %v283_v15 }
  0x82   : > { %313 = vst [vmem:[#allocation7 + $0x8] sm:$0xff] %v311_v18 }
  0x83 PF: > { %p496_p8 = scmp.le.s32.totalorder %s513_s26, 40 }
  0x84   : > { %v320_v19 = vlaneseq (!%p496_p8)  ;;  %v325_v20 = vld [vmem:[%s890_s27] sm:$0xff] (!%p496_p8)  ;;  %s353_s12 = sadd.s32 (!%p496_p8), 8, %s904_s8  ;;  %v333_v22 = vstv (!%p496_p8), %s904_s8  ;;  %v498_v23 = vld [vmem:[%s890_s27 + $0x10] sm:$0xff] (!%p496_p8)  ;;  %v326_v27 = vld [vmem:[%s890_s27 + $0x8] sm:$0xff] (!%p496_p8) }
  0x85   : > { %316 = sbr.rel (%p496_p8) target bundleno = 145 (0x91), region = 48  ;;  %v329_v21 = vld [vmem:[%s896_s25] sm:$0xff] (!%p496_p8)  ;;  %v500_v24 = vld [vmem:[%s896_s25 + $0x10] sm:$0xff] (!%p496_p8)  ;;  %v354_v25 = vstv (!%p496_p8), %s353_s12  ;;  %v330_v28 = vld [vmem:[%s896_s25 + $0x8] sm:$0xff] (!%p496_p8) }
  0x86   : > { %v321_v26 = vshrl.u32 (!%p496_p8), %v320_v19, 7  ;;  %v499_v29 = vld [vmem:[%s890_s27 + $0x18] sm:$0xff] (!%p496_p8)  ;;  %v331_v30 = vadd.f32 (!%p496_p8), %v329_v21, %v325_v20  ;;  %v351_v31 = vadd.f32 (!%p496_p8), %v500_v24, %v498_v23  ;;  %v332_v32 = vadd.f32 (!%p496_p8), %v330_v28, %v326_v27 }
  0x87   : > { %v501_v33 = vld [vmem:[%s896_s25 + $0x18] sm:$0xff] (!%p496_p8) }
  0x88   : > { %v334_v34 = vadd.s32 (!%p496_p8), %v333_v22, %v321_v26  ;;  %v355_v35 = vadd.s32 (!%p496_p8), %v354_v25, %v321_v26  ;;  %v352_v36 = vadd.f32 (!%p496_p8), %v501_v33, %v499_v29 }
  0x89   : > { %v318_v40 = vld [vmem:[#allocation7 + $0x8] sm:$0xff] (!%p496_p8) }
  0x8a   : > { %vm335_vm0 = vcmp.lt.s32.totalorder (!%p496_p8), %v334_v34, 40  ;;  %vm356_vm1 = vcmp.lt.s32.totalorder (!%p496_p8), %v355_v35, 40  ;;  %v317_v37 = vld [vmem:[#allocation7] sm:$0xff] (!%p496_p8) }
  0x8b   : > { %v338_v38 = vsel (!%p496_p8), %vm335_vm0, %v331_v30, 0.0  ;;  %v359_v39 = vsel (!%p496_p8), %vm356_vm1, %v351_v31, 0.0  ;;  %v339_v41 = vsel (!%p496_p8), %vm335_vm0, %v332_v32, 0.0  ;;  %v360_v42 = vsel (!%p496_p8), %vm356_vm1, %v352_v36, 0.0 }
  0x8c   : > { %v361_v43 = vadd.f32 %v359_v39, %v338_v38  ;;  %v362_v44 = vadd.f32 %v360_v42, %v339_v41 }
  0x8e   : > { %v363_v45 = vadd.f32 %v361_v43, %v317_v37  ;;  %v364_v46 = vadd.f32 %v362_v44, %v318_v40 }
  0x90   : > { %365 = vst [vmem:[#allocation7] sm:$0xff] %v363_v45  ;;  %366 = vst [vmem:[#allocation7 + $0x8] sm:$0xff] %v364_v46 }
  0x91 PF: > { %p927_p2 = scmp.eq.s32.totalorder %s465_s16, 2  ;;  %s725_s29 = smov [#allocation7]  }
  0x92   : > { %s377_s3 = sshll.u32 %s725_s29, 4  ;;  %s378_s3 = int_to_ptr.vmem [resolvable:$true] %s377_s3 }
  0x93   : > { %s632_s17 = scalar_lea.vmem %s378_s3, 256  ;;  %p639_p12 = scmp.lt.s32.totalorder %s378_s3, %s378_s3 }
  0x94   : > { %p633_p3 = scmp.ne.s32.totalorder %s378_s3, %s632_s17  ;;  %p640_p5 = scmp.lt.s32.totalorder %s632_s17, %s632_s17 }
  0x96   : > { %p634_p4 = pnand %p633_p3, %p927_p2  ;;  %p641_p9 = por %p640_p5, %p639_p12 }
  0x98   : > { %p635_p1 = pneg %p634_p4 }
  0x9a   : > { %p642_p10 = pnand %p641_p9, %p635_p1 }
  0x9c   : > { %645 = shalt.err (!%p642_p10)
}
  0x9d   : > { %s646_s16 = scalar_lea.hbm %s973_s2, 256 }
  0x9e   : > { %p647_p6 = scmp.ne.s32.totalorder %s973_s2, %s646_s16  ;;  %p652_p7 = scmp.lt.u32.totalorder %s646_s16, %s973_s2 }
  0xa0   : > { %p648_p11 = pnand %p647_p6, %p927_p2 }
  0xa2   : > { %p649_p13 = pneg %p648_p11 }
  0xa4   : > { %p654_p0 = pnand %p652_p7, %p649_p13 }
  0xa6   : > { %657 = shalt.err (!%p654_p0)
}
  0xa7   : > { %517 = dma.vmem_to_hbm [thread:$0]  (%p927_p2), %s378_s3, 256, %s973_s2, [#allocation4]  }
  0xa8   : > { %691 = dma.done.wait (%p927_p2), [#allocation4], 256  }
  0xa9   : > { %693 = vsyncadd (%p927_p2), [#allocation4], 4294967040 }
  0xaa PF: > { %s19_s14 = sadd.s32 1, %s716_s14   ;;  %s977_s9 = smov %s700_s10 }
  0xab   : > { %p16_p8 = scmp.ge.s32.totalorder %s19_s14, 5   ;;  %s978_s10 = smov %s704_s11 }
  0xac   : > { %s979_s11 = smov %s796_s23  ;;  %s980_s12 = smov %s712_s13 }
  0xad   : > { %s981_s13 = smov %s983_s15  ;;  %18 = sbr.rel (!%p16_p8) target bundleno = 7 (0x7), region = 99 }
  0xb4   :  { %390 = vsyncpa [#allocation3], 1 }
  0xb5   :  { %392 = vsyncpa [#allocation3 + $0x1], 1 }
  0xb6   :  { %393 = vsyncpa [#allocation6], 1 }
  0xb7   :  { %395 = vsyncpa [#allocation6 + $0x1], 1 }
  0xb8   :  { %396 = vsyncpa [#allocation4], 1 }
  0xb9   :  { %398 = vsyncpa [#allocation4 + $0x1], 1 }

</bundles_post_ra>
